<compile_context>
chip_gen: v6e
topology: v6e:2x2x1
jax: 0.10.0
libtpu: 0.0.40
codegen_flags: <defaults>
</compile_context>

<pallas_src>
import functools
import math

import jax
import jax.numpy as jnp
from jax.experimental import pallas as pl
from jax.experimental.pallas import tpu as pltpu

_INV_SQRT2 = 0.7071067811865476


def _round_up(x, m):
    return ((x + m - 1) // m) * m


# ---------------------------------------------------------------------------
# Fused kernel: runs the entire top-down mixing chain for one row-tile.
#   refs = [x_0 .. x_N,  (w1t, b1, w2t, b2) * N,  y_1 .. y_N]
#   x_k : [TM, T_k]  trend at scale k (coarsest first, k = 0 .. N)
#   y_k : [TM, T_k]  mixed trend at scale k (k = 1 .. N)
# Per layer i (T_in = T_i, T_out = T_{i+1}):
#   cur <- x_{i+1} + Linear2(GELU(Linear1(cur)))      (time-dim Linears)
# ---------------------------------------------------------------------------
def _fused_mix_kernel(*refs, num_layers):
    n = num_layers
    x_refs = refs[: n + 1]
    p_refs = refs[n + 1: n + 1 + 4 * n]
    y_refs = refs[n + 1 + 4 * n:]

    cur = x_refs[0][...].astype(jnp.float32)
    for i in range(n):
        w1t = p_refs[4 * i][...]        # [T_in,  T_out]
        b1 = p_refs[4 * i + 1][...]     # [1,     T_out]
        w2t = p_refs[4 * i + 2][...]    # [T_out, T_out]
        b2 = p_refs[4 * i + 3][...]     # [1,     T_out]

        h = jnp.dot(cur, w1t, preferred_element_type=jnp.float32) + b1
        # exact (erf-based) GELU, matching torch.nn.GELU() default
        h = 0.5 * h * (1.0 + jax.lax.erf(h * _INV_SQRT2))
        y = jnp.dot(h, w2t, preferred_element_type=jnp.float32) + b2

        cur = x_refs[i + 1][...].astype(jnp.float32) + y
        y_refs[i][...] = cur.astype(y_refs[i].dtype)


def _pick_tile_m(M, t_sizes, n_layers, tile_m_max=512):
    """Pick a row-tile size (multiple of 8) that fits the VMEM budget."""
    sum_in = sum(t_sizes)
    sum_out = sum(t_sizes[1:])
    t_max = max(t_sizes)
    # f32 bytes per row held in VMEM: double-buffered inputs + outputs, plus
    # ~4 live f32 intermediates of width t_max.
    per_row = 4 * (2 * sum_in + 2 * sum_out + 4 * t_max)

    w_bytes = 0
    for i in range(n_layers):
        t_in, t_out = t_sizes[i], t_sizes[i + 1]
        w_bytes += 4 * (t_in * t_out + t_out * t_out + 2 * t_out)

    budget = max(4 * 1024 * 1024, 24 * 1024 * 1024 - 2 * w_bytes)

    tm = min(tile_m_max, _round_up(M, 8))
    tm = max(8, (tm // 8) * 8)
    while tm > 8 and tm * per_row > budget:
        tm = max(8, tm // 2)
    return tm


def _fused_trend_mix(x2d_list, params, tile_m, out_dtype):
    """x2d_list: [M_pad, T_k] slabs (coarsest first). Returns N mixed slabs."""
    n = len(params)
    m_pad = x2d_list[0].shape[0]
    t_sizes = [int(x.shape[1]) for x in x2d_list]
    grid = (m_pad // tile_m,)

    in_specs = [pl.BlockSpec((tile_m, t), lambda i: (i, 0)) for t in t_sizes]
    flat_params = []
    for (w1t, b1, w2t, b2) in params:
        t_in, t_out = w1t.shape
        in_specs += [
            pl.BlockSpec((t_in, t_out), lambda i: (0, 0)),   # resident
            pl.BlockSpec((1, t_out), lambda i: (0, 0)),
            pl.BlockSpec((t_out, t_out), lambda i: (0, 0)),
            pl.BlockSpec((1, t_out), lambda i: (0, 0)),
        ]
        flat_params += [w1t, b1, w2t, b2]

    out_shapes = tuple(
        jax.ShapeDtypeStruct((m_pad, t_sizes[k + 1]), out_dtype)
        for k in range(n))
    out_specs = tuple(
        pl.BlockSpec((tile_m, t_sizes[k + 1]), lambda i: (i, 0))
        for k in range(n))

    # advisory cost estimate
    flops = 0
    transcendentals = 0
    for i in range(n):
        t_in, t_out = t_sizes[i], t_sizes[i + 1]
        flops += 2 * m_pad * (t_in * t_out + t_out * t_out)
        transcendentals += m_pad * t_out
    out_itemsize = jnp.dtype(out_dtype).itemsize
    bytes_accessed = sum(int(x.size) * x.dtype.itemsize for x in x2d_list)
    bytes_accessed += sum(int(w.size) * w.dtype.itemsize
                          for p in params for w in p)
    bytes_accessed += sum(m_pad * t_sizes[k + 1] * out_itemsize
                          for k in range(n))

    kernel = functools.partial(_fused_mix_kernel, num_layers=n)

    outs = pl.pallas_call(
        kernel,
        out_shape=out_shapes,
        grid=grid,
        in_specs=in_specs,
        out_specs=out_specs,
        compiler_params=pltpu.CompilerParams(
            dimension_semantics=("parallel",),
            vmem_limit_bytes=32 * 1024 * 1024,
        ),
        cost_estimate=pl.CostEstimate(
            flops=int(flops),
            transcendentals=int(transcendentals),
            bytes_accessed=int(bytes_accessed),
        ),
    )(*x2d_list, *flat_params)
    return list(outs)


# ---------------------------------------------------------------------------
# Module-equivalent wrapper
# ---------------------------------------------------------------------------
class MultiScaleTrendMixing:
    """JAX/Pallas port of TimeMixer's MultiScaleTrendMixing.

    Parameters are initialized deterministically (PyTorch-Linear-style
    uniform init) from a fixed PRNG key.
    """

    def __init__(self, seq_len, down_sampling_window, down_sampling_layers,
                 key=jax.random.PRNGKey(0)):
        self.seq_len = seq_len
        self.down_sampling_window = down_sampling_window
        self.down_sampling_layers = down_sampling_layers
        self.params = []
        # ModuleList order: reversed(range(down_sampling_layers)) ->
        # params[0] up-samples the coarsest scale.
        for i in reversed(range(down_sampling_layers)):
            t_in = seq_len // down_sampling_window ** (i + 1)
            t_out = seq_len // down_sampling_window ** i
            key, k1, k2, k3, k4 = jax.random.split(key, 5)
            bound1 = 1.0 / math.sqrt(t_in)
            bound2 = 1.0 / math.sqrt(t_out)
            # stored already transposed: [in, out]
            w1t = jax.random.uniform(k1, (t_in, t_out), jnp.float32,
                                     -bound1, bound1)
            b1 = jax.random.uniform(k2, (1, t_out), jnp.float32,
                                    -bound1, bound1)
            w2t = jax.random.uniform(k3, (t_out, t_out), jnp.float32,
                                     -bound2, bound2)
            b2 = jax.random.uniform(k4, (1, t_out), jnp.float32,
                                    -bound2, bound2)
            self.params.append((w1t, b1, w2t, b2))

    def __call__(self, trend_list, tile_m=None):
        """trend_list: list of [B, D, T_i] arrays, finest (longest T) first."""
        rev = list(trend_list)[::-1]                     # coarsest first
        B, D, _ = rev[0].shape
        M = B * D
        n = len(rev) - 1
        out_dtype = rev[0].dtype
        t_sizes = [int(x.shape[-1]) for x in rev]

        # flatten [B, D, T] -> [M, T] (no data movement)
        x2d = [x.reshape(M, x.shape[-1]) for x in rev]

        if tile_m is None:
            tm = _pick_tile_m(M, t_sizes, n)
        else:
            tm = max(8, (int(tile_m) // 8) * 8)
            tm = min(tm, _round_up(M, 8))

        m_pad = _round_up(M, tm)
        if m_pad != M:
            x2d = [jnp.pad(x, ((0, m_pad - M), (0, 0))) for x in x2d]

        y2d = _fused_trend_mix(x2d, self.params[:n], tm, out_dtype)

        out_trend_list = [jnp.transpose(rev[0], (0, 2, 1))]
        for k in range(n):
            y = y2d[k][:M].reshape(B, D, t_sizes[k + 1])
            out_trend_list.append(jnp.transpose(y, (0, 2, 1)))
        out_trend_list.reverse()                         # finest first again
        return out_trend_list

    # pure-JAX reference (same math, no Pallas) for correctness checking
    def reference(self, trend_list):
        rev = list(trend_list)[::-1]
        out_low = rev[0]
        out_high = rev[1]
        outs = [jnp.transpose(out_low, (0, 2, 1))]
        for i in range(len(rev) - 1):
            w1t, b1, w2t, b2 = self.params[i]
            h = out_low.astype(jnp.float32) @ w1t + b1[0]
            h = 0.5 * h * (1.0 + jax.lax.erf(h * _INV_SQRT2))
            res = h @ w2t + b2[0]
            out_high = out_high.astype(jnp.float32) + res
            out_low = out_high
            if i + 2 <= len(rev) - 1:
                out_high = rev[i + 2]
            outs.append(jnp.transpose(out_low, (0, 2, 1)))
        outs.reverse()
        return outs


if __name__ == "__main__":
    # configs: seq_len=16, down_sampling_window=2, down_sampling_layers=2
    seq_len, dw, layers = 16, 2, 2
    B, D = 3, 5          # M = B*D = 15 -> exercises row padding + multi-tile grid

    key = jax.random.PRNGKey(0)
    kx, kp = jax.random.split(key)

    # trend_list: [B, D, T_i] with T_i = seq_len // dw**i  -> 16, 8, 4
    trend_list = []
    for i in range(layers + 1):
        kx, sub = jax.random.split(kx)
        t_i = seq_len // dw ** i
        trend_list.append(jax.random.normal(sub, (B, D, t_i), jnp.float32))

    model = MultiScaleTrendMixing(seq_len, dw, layers, key=kp)
    refs = model.reference(trend_list)

    # 1) tiled path (tile_m=8 -> 2 pipelined grid steps + padded ragged rows)
    outs = model(trend_list, tile_m=8)
    outs = [jax.block_until_ready(o) for o in outs]
    for o, r in zip(outs, refs):
        assert o.shape == r.shape, (o.shape, r.shape)
        assert float(jnp.max(jnp.abs(o - r))) < 1e-3

    # 2) default (auto-sized single tile) path
    outs2 = model(trend_list)
    outs2 = [jax.block_until_ready(o) for o in outs2]
    for o, r in zip(outs2, refs):
        assert o.shape == r.shape, (o.shape, r.shape)
        assert float(jnp.max(jnp.abs(o - r))) < 1e-3

    print("KERNEL_OK")
</pallas_src>

<mosaic_0001>
module attributes {stable_mosaic.version = 11 : i64} {
  func.func @_fused_mix_kernel(%arg0: i32, %arg1: memref<8x4xf32, #tpu.memory_space<vmem>>, %arg2: memref<8x8xf32, #tpu.memory_space<vmem>>, %arg3: memref<8x16xf32, #tpu.memory_space<vmem>>, %arg4: memref<4x8xf32, #tpu.memory_space<vmem>>, %arg5: memref<1x8xf32, #tpu.memory_space<vmem>>, %arg6: memref<8x8xf32, #tpu.memory_space<vmem>>, %arg7: memref<1x8xf32, #tpu.memory_space<vmem>>, %arg8: memref<8x16xf32, #tpu.memory_space<vmem>>, %arg9: memref<1x16xf32, #tpu.memory_space<vmem>>, %arg10: memref<16x16xf32, #tpu.memory_space<vmem>>, %arg11: memref<1x16xf32, #tpu.memory_space<vmem>>, %arg12: memref<8x8xf32, #tpu.memory_space<vmem>>, %arg13: memref<8x16xf32, #tpu.memory_space<vmem>>) attributes {dimension_semantics = [#tpu.dimension_semantics<parallel>], iteration_bounds = array<i64: 2>, scalar_prefetch = 0 : i64, scratch_operands = 0 : i64, tpu.core_type = #tpu.core_type<tc>, window_params = [{transform_indices = @transform_0, window_bounds = array<i64: 8, 4>}, {transform_indices = @transform_1, window_bounds = array<i64: 8, 8>}, {transform_indices = @transform_2, window_bounds = array<i64: 8, 16>}, {pipeline_mode = #tpu.pipeline_mode<synchronous>, transform_indices = @transform_3, window_bounds = array<i64: 4, 8>}, {pipeline_mode = #tpu.pipeline_mode<synchronous>, transform_indices = @transform_4, window_bounds = array<i64: 1, 8>}, {pipeline_mode = #tpu.pipeline_mode<synchronous>, transform_indices = @transform_5, window_bounds = array<i64: 8, 8>}, {pipeline_mode = #tpu.pipeline_mode<synchronous>, transform_indices = @transform_6, window_bounds = array<i64: 1, 8>}, {pipeline_mode = #tpu.pipeline_mode<synchronous>, transform_indices = @transform_7, window_bounds = array<i64: 8, 16>}, {pipeline_mode = #tpu.pipeline_mode<synchronous>, transform_indices = @transform_8, window_bounds = array<i64: 1, 16>}, {pipeline_mode = #tpu.pipeline_mode<synchronous>, transform_indices = @transform_9, window_bounds = array<i64: 16, 16>}, {pipeline_mode = #tpu.pipeline_mode<synchronous>, transform_indices = @transform_10, window_bounds = array<i64: 1, 16>}, {transform_indices = @transform_11, window_bounds = array<i64: 8, 8>}, {transform_indices = @transform_12, window_bounds = array<i64: 8, 16>}]} {
    %c0 = arith.constant 0 : index
    %c0_0 = arith.constant 0 : index
    %0 = vector.load %arg1[%c0, %c0_0] : memref<8x4xf32, #tpu.memory_space<vmem>>, vector<8x4xf32>
    %c0_1 = arith.constant 0 : index
    %c0_2 = arith.constant 0 : index
    %1 = vector.load %arg4[%c0_1, %c0_2] : memref<4x8xf32, #tpu.memory_space<vmem>>, vector<4x8xf32>
    %c0_3 = arith.constant 0 : index
    %c0_4 = arith.constant 0 : index
    %2 = vector.load %arg5[%c0_3, %c0_4] : memref<1x8xf32, #tpu.memory_space<vmem>>, vector<1x8xf32>
    %c0_5 = arith.constant 0 : index
    %c0_6 = arith.constant 0 : index
    %3 = vector.load %arg6[%c0_5, %c0_6] : memref<8x8xf32, #tpu.memory_space<vmem>>, vector<8x8xf32>
    %c0_7 = arith.constant 0 : index
    %c0_8 = arith.constant 0 : index
    %4 = vector.load %arg7[%c0_7, %c0_8] : memref<1x8xf32, #tpu.memory_space<vmem>>, vector<1x8xf32>
    %cst = arith.constant dense<0.000000e+00> : vector<8x8xf32>
    %5 = tpu.matmul %0, %1, %cst {dimension_numbers = #tpu.dot_dimension_numbers<[1], [0], [0], [1], [0, 0, 1, 1], [], []>} : vector<8x4xf32>, vector<4x8xf32>, vector<8x8xf32> -> vector<8x8xf32>
    %6 = vector.broadcast %2 : vector<1x8xf32> to vector<8x8xf32>
    %7 = arith.addf %5, %6 : vector<8x8xf32>
    %cst_9 = arith.constant 5.000000e-01 : f32
    %8 = vector.broadcast %cst_9 : f32 to vector<8x8xf32>
    %9 = arith.mulf %8, %7 : vector<8x8xf32>
    %cst_10 = arith.constant 0.707106769 : f32
    %10 = vector.broadcast %cst_10 : f32 to vector<8x8xf32>
    %11 = arith.mulf %7, %10 : vector<8x8xf32>
    %12 = math.erf %11 : vector<8x8xf32>
    %cst_11 = arith.constant 1.000000e+00 : f32
    %13 = vector.broadcast %cst_11 : f32 to vector<8x8xf32>
    %14 = arith.addf %13, %12 : vector<8x8xf32>
    %15 = arith.mulf %9, %14 : vector<8x8xf32>
    %cst_12 = arith.constant dense<0.000000e+00> : vector<8x8xf32>
    %16 = tpu.matmul %15, %3, %cst_12 {dimension_numbers = #tpu.dot_dimension_numbers<[1], [0], [0], [1], [0, 0, 1, 1], [], []>} : vector<8x8xf32>, vector<8x8xf32>, vector<8x8xf32> -> vector<8x8xf32>
    %17 = vector.broadcast %4 : vector<1x8xf32> to vector<8x8xf32>
    %18 = arith.addf %16, %17 : vector<8x8xf32>
    %c0_13 = arith.constant 0 : index
    %c0_14 = arith.constant 0 : index
    %19 = vector.load %arg2[%c0_13, %c0_14] : memref<8x8xf32, #tpu.memory_space<vmem>>, vector<8x8xf32>
    %20 = arith.addf %19, %18 : vector<8x8xf32>
    %c0_15 = arith.constant 0 : index
    %c0_16 = arith.constant 0 : index
    %21 = vector.load %arg12[%c0_15, %c0_16] : memref<8x8xf32, #tpu.memory_space<vmem>>, vector<8x8xf32>
    tpu.vector_store %arg12[%c0_15, %c0_16], %20 {strides = array<i32>} : memref<8x8xf32, #tpu.memory_space<vmem>>, vector<8x8xf32>,
    %c0_17 = arith.constant 0 : index
    %c0_18 = arith.constant 0 : index
    %22 = vector.load %arg8[%c0_17, %c0_18] : memref<8x16xf32, #tpu.memory_space<vmem>>, vector<8x16xf32>
    %c0_19 = arith.constant 0 : index
    %c0_20 = arith.constant 0 : index
    %23 = vector.load %arg9[%c0_19, %c0_20] : memref<1x16xf32, #tpu.memory_space<vmem>>, vector<1x16xf32>
    %c0_21 = arith.constant 0 : index
    %c0_22 = arith.constant 0 : index
    %24 = vector.load %arg10[%c0_21, %c0_22] : memref<16x16xf32, #tpu.memory_space<vmem>>, vector<16x16xf32>
    %c0_23 = arith.constant 0 : index
    %c0_24 = arith.constant 0 : index
    %25 = vector.load %arg11[%c0_23, %c0_24] : memref<1x16xf32, #tpu.memory_space<vmem>>, vector<1x16xf32>
    %cst_25 = arith.constant dense<0.000000e+00> : vector<8x16xf32>
    %26 = tpu.matmul %20, %22, %cst_25 {dimension_numbers = #tpu.dot_dimension_numbers<[1], [0], [0], [1], [0, 0, 1, 1], [], []>} : vector<8x8xf32>, vector<8x16xf32>, vector<8x16xf32> -> vector<8x16xf32>
    %27 = vector.broadcast %23 : vector<1x16xf32> to vector<8x16xf32>
    %28 = arith.addf %26, %27 : vector<8x16xf32>
    %cst_26 = arith.constant 5.000000e-01 : f32
    %29 = vector.broadcast %cst_26 : f32 to vector<8x16xf32>
    %30 = arith.mulf %29, %28 : vector<8x16xf32>
    %cst_27 = arith.constant 0.707106769 : f32
    %31 = vector.broadcast %cst_27 : f32 to vector<8x16xf32>
    %32 = arith.mulf %28, %31 : vector<8x16xf32>
    %33 = math.erf %32 : vector<8x16xf32>
    %cst_28 = arith.constant 1.000000e+00 : f32
    %34 = vector.broadcast %cst_28 : f32 to vector<8x16xf32>
    %35 = arith.addf %34, %33 : vector<8x16xf32>
    %36 = arith.mulf %30, %35 : vector<8x16xf32>
    %cst_29 = arith.constant dense<0.000000e+00> : vector<8x16xf32>
    %37 = tpu.matmul %36, %24, %cst_29 {dimension_numbers = #tpu.dot_dimension_numbers<[1], [0], [0], [1], [0, 0, 1, 1], [], []>} : vector<8x16xf32>, vector<16x16xf32>, vector<8x16xf32> -> vector<8x16xf32>
    %38 = vector.broadcast %25 : vector<1x16xf32> to vector<8x16xf32>
    %39 = arith.addf %37, %38 : vector<8x16xf32>
    %c0_30 = arith.constant 0 : index
    %c0_31 = arith.constant 0 : index
    %40 = vector.load %arg3[%c0_30, %c0_31] : memref<8x16xf32, #tpu.memory_space<vmem>>, vector<8x16xf32>
    %41 = arith.addf %40, %39 : vector<8x16xf32>
    %c0_32 = arith.constant 0 : index
    %c0_33 = arith.constant 0 : index
    %42 = vector.load %arg13[%c0_32, %c0_33] : memref<8x16xf32, #tpu.memory_space<vmem>>, vector<8x16xf32>
    tpu.vector_store %arg13[%c0_32, %c0_33], %41 {strides = array<i32>} : memref<8x16xf32, #tpu.memory_space<vmem>>, vector<8x16xf32>,
    return
  }
  func.func @transform_0(%arg0: i32) -> (i32, i32) {
    %c0_i32 = arith.constant 0 : i32
    %c0_i32_0 = arith.constant 0 : i32
    return %arg0, %c0_i32 : i32, i32
  }
  func.func @transform_1(%arg0: i32) -> (i32, i32) {
    %c0_i32 = arith.constant 0 : i32
    %c0_i32_0 = arith.constant 0 : i32
    return %arg0, %c0_i32 : i32, i32
  }
  func.func @transform_2(%arg0: i32) -> (i32, i32) {
    %c0_i32 = arith.constant 0 : i32
    %c0_i32_0 = arith.constant 0 : i32
    return %arg0, %c0_i32 : i32, i32
  }
  func.func @transform_3(%arg0: i32) -> (i32, i32) {
    %c0_i32 = arith.constant 0 : i32
    %c0_i32_0 = arith.constant 0 : i32
    %c0_i32_1 = arith.constant 0 : i32
    return %c0_i32, %c0_i32_0 : i32, i32
  }
  func.func @transform_4(%arg0: i32) -> (i32, i32) {
    %c0_i32 = arith.constant 0 : i32
    %c0_i32_0 = arith.constant 0 : i32
    %c0_i32_1 = arith.constant 0 : i32
    return %c0_i32, %c0_i32_0 : i32, i32
  }
  func.func @transform_5(%arg0: i32) -> (i32, i32) {
    %c0_i32 = arith.constant 0 : i32
    %c0_i32_0 = arith.constant 0 : i32
    %c0_i32_1 = arith.constant 0 : i32
    return %c0_i32, %c0_i32_0 : i32, i32
  }
  func.func @transform_6(%arg0: i32) -> (i32, i32) {
    %c0_i32 = arith.constant 0 : i32
    %c0_i32_0 = arith.constant 0 : i32
    %c0_i32_1 = arith.constant 0 : i32
    return %c0_i32, %c0_i32_0 : i32, i32
  }
  func.func @transform_7(%arg0: i32) -> (i32, i32) {
    %c0_i32 = arith.constant 0 : i32
    %c0_i32_0 = arith.constant 0 : i32
    %c0_i32_1 = arith.constant 0 : i32
    return %c0_i32, %c0_i32_0 : i32, i32
  }
  func.func @transform_8(%arg0: i32) -> (i32, i32) {
    %c0_i32 = arith.constant 0 : i32
    %c0_i32_0 = arith.constant 0 : i32
    %c0_i32_1 = arith.constant 0 : i32
    return %c0_i32, %c0_i32_0 : i32, i32
  }
  func.func @transform_9(%arg0: i32) -> (i32, i32) {
    %c0_i32 = arith.constant 0 : i32
    %c0_i32_0 = arith.constant 0 : i32
    %c0_i32_1 = arith.constant 0 : i32
    return %c0_i32, %c0_i32_0 : i32, i32
  }
  func.func @transform_10(%arg0: i32) -> (i32, i32) {
    %c0_i32 = arith.constant 0 : i32
    %c0_i32_0 = arith.constant 0 : i32
    %c0_i32_1 = arith.constant 0 : i32
    return %c0_i32, %c0_i32_0 : i32, i32
  }
  func.func @transform_11(%arg0: i32) -> (i32, i32) {
    %c0_i32 = arith.constant 0 : i32
    %c0_i32_0 = arith.constant 0 : i32
    return %arg0, %c0_i32 : i32, i32
  }
  func.func @transform_12(%arg0: i32) -> (i32, i32) {
    %c0_i32 = arith.constant 0 : i32
    %c0_i32_0 = arith.constant 0 : i32
    return %arg0, %c0_i32 : i32, i32
  }
}

</mosaic_0001>

<bundles_post_ra>
// kernel: tpu_custom_call.1
= control target key start
LH: loop header
LB: loop body
LE: loop exit
PB: predicated region body
PF: predicated region fallthrough
CT: control target
= control target key end

     0   :  { %s1537_s0 = inlined_call_operand.vmem [shape: f32[16,4], index: 0, kind: input, shape index: {}]   ;;  %s1538_s1 = inlined_call_operand.vmem [shape: f32[16,8], index: 1, kind: input, shape index: {}]   ;;  %s1539_s2 = inlined_call_operand.vmem [shape: f32[16,16], index: 2, kind: input, shape index: {}]   ;;  %s1540_s3 = inlined_call_operand.hbm [shape: f32[4,8], index: 3, kind: input, shape index: {}]   ;;  %s1541_s4 = inlined_call_operand.hbm [shape: f32[1,8], index: 4, kind: input, shape index: {}]   ;;  %s1542_s5 = inlined_call_operand.vmem [shape: f32[8,8], index: 5, kind: input, shape index: {}]   ;;  %s1543_s6 = inlined_call_operand.hbm [shape: f32[1,8], index: 6, kind: input, shape index: {}]   ;;  %s1544_s7 = inlined_call_operand.vmem [shape: f32[8,16], index: 7, kind: input, shape index: {}]   ;;  %s1545_s8 = inlined_call_operand.vmem [shape: f32[1,16], index: 8, kind: input, shape index: {}]   ;;  %s1546_s9 = inlined_call_operand.vmem [shape: f32[16,16], index: 9, kind: input, shape index: {}]   ;;  %s1547_s10 = inlined_call_operand.vmem [shape: f32[1,16], index: 10, kind: input, shape index: {}]   ;;  %s1548_s11 = inlined_call_operand.vmem [shape: f32[16,8], index: 11, kind: output, shape index: {0}]   ;;  %s1549_s12 = inlined_call_operand.hbm [shape: f32[16,16], index: 12, kind: output, shape index: {1}]  }
   0x1   :  { %1553 = sst [smem:[#allocation13_spill]] %s1537_s0 }
   0x2   :  { %1554 = sst [smem:[#allocation14_spill]] %s1538_s1 }
   0x3   :  { %1555 = sst [smem:[#allocation15_spill]] %s1540_s3 }
   0x4   :  { %1556 = sst [smem:[#allocation16_spill]] %s1541_s4 }
   0x5   :  { %18 = vsyncpa [#allocation3], 0 }
   0x6   :  { %19 = vsyncpa [#allocation6], 0 }
   0x7   :  { %20 = vsyncpa [#allocation4], 0 }
   0x8   :  { %22 = vsyncpa [#allocation4 + $0x1], 0  ;;  %s1354_s21 = smov 0   ;;  %s1356_s22 = smov 0  }
   0x9   :  { %s1358_s23 = smov 0   ;;  %s1360_s24 = smov 0  }
   0xa LB: > { %s1375_s25 = sadd.s32 4294967295, %s1281_s24   ;;  %s1000_s26 = sadd.s32 4294967294, %s1281_s24   ;;  %s1281_s24 = sphi %s1360_s24, %s1577_s24   ;;  %s1277_s23 = sphi %s1358_s23, %s1576_s23   ;;  %s1273_s22 = sphi %s1356_s22, %s1575_s22   ;;  %s1269_s21 = sphi %s1354_s21, %s1574_s21  }
   0xb   : > { %s1379_s27 = sadd.s32 1, %s1281_s24   ;;  %s307_s28 = sadd.s32 1, %s1277_s23 }
   0xc   : > { %s304_s29 = ssub.s32 %s1281_s24, %s1379_s27  ;;  %p317_p0 = scmp.ne.s32.totalorder %s1277_s23, %s1273_s22 }
   0xd   : > { %p305_p1 = scmp.eq.s32.totalorder %s304_s29, 0  ;;  %p318_p2 = scmp.eq.s32.totalorder %s1375_s25, 1 }
   0xe   : > { %p323_p3 = scmp.ne.s32.totalorder %s1273_s22, %s1269_s21  ;;  %p324_p4 = scmp.eq.s32.totalorder %s1000_s26, 1 }
   0xf   : > { %s1390_s30 = scalar_select %p305_p1, %s1277_s23, %s307_s28  }
  0x10   : > { %p1392_p5 = por %p318_p2, %p317_p0  ;;  %p1396_p6 = por %p324_p4, %p323_p3 }
  0x11   : > { %1557 = sst [smem:[#allocation12_spill]] %s1390_s30  ;;  %p1001_p7 = scmp.ge.s32.totalorder %s1281_s24, 1 }
  0x12   : > { %s1558_s13 = scalar_select %p1392_p5, 1, 0 }
  0x13   : > { %s1559_s14 = scalar_select %p1396_p6, 1, 0 }
  0x14   : > { %p331_p8 = scmp.lt.s32.totalorder %s1281_s24, 3  ;;  %p1550_p9 = scmp.eq.s32.totalorder %s1375_s25, 0 }
  0x15   : > { %s1283_s16 = smov [#allocation5]   ;;  %s1284_s18 = smov [#allocation2]  }
  0x16   : > { %p1403_p10 = pnand %p1001_p7, %p331_p8  ;;  %s355_s17 = sshll.u32 %s1283_s16, 4  ;;  %s356_s17 = int_to_ptr.vmem [resolvable:$true] %s355_s17 }
  0x17   : > { %s344_s19 = sshll.u32 %s1284_s18, 4  ;;  %s1285_s26 = smov [#allocation7]   ;;  %s345_s19 = int_to_ptr.vmem [resolvable:$true] %s344_s19 }
  0x18   : > { %s1560_s15 = scalar_select %p1403_p10, 1, 0 }
  0x19   : > { %p1073_p11 = pneg %p1403_p10  ;;  %s369_s28 = sshll.u32 %s1285_s26, 4  ;;  %s1415_s28 = int_to_ptr.vmem [resolvable:$true] %s369_s28 }
  0x1a   : > { %s1146_s29 = scalar_lea.vmem %s356_s17, 16  ;;  %s1153_s16 = scalar_lea.vmem %s356_s17, 32 }
  0x1b   : > { %p1411_p12 = pnand %p1550_p9, %p1073_p11  ;;  %p1147_p0 = scmp.ne.s32.totalorder %s356_s17, %s1146_s29 }
  0x1c   : > { %p1154_p3 = scmp.lt.s32.totalorder %s356_s17, %s356_s17  ;;  %p1155_p4 = scmp.lt.s32.totalorder %s1153_s16, %s1146_s29 }
  0x1d   : > { %p1137_p13 = pneg %p1411_p12 }
  0x1e   : > { %p1156_p7 = por %p1155_p4, %p1154_p3 }
  0x1f   : > { %p1149_p1 = pnand %p1147_p0, %p1137_p13 }
  0x21   : > { %p1150_p2 = pneg %p1149_p1 }
  0x23   : > { %p1157_p8 = pnand %p1156_p7, %p1150_p2 }
  0x25   : > { %1160 = shalt.err (!%p1157_p8)
}
  0x26   : > { %s1562_s4 = sld [smem:[#allocation16_spill]]  ;;  %s1172_s30 = scalar_lea.vmem %s345_s19, 64 }
  0x27   : > { %p1173_p11 = scmp.ne.s32.totalorder %s345_s19, %s1172_s30  ;;  %p1180_p1 = scmp.lt.s32.totalorder %s345_s19, %s345_s19 }
  0x28   : > { %p1181_p6 = scmp.lt.s32.totalorder %s1172_s30, %s1172_s30 }
  0x29   : > { %p1175_p9 = pnand %p1173_p11, %p1137_p13 }
  0x2a   : > { %p1182_p5 = por %p1181_p6, %p1180_p1 }
  0x2b   : > { %p1176_p0 = pneg %p1175_p9 }
  0x2c   : > { %1079 = dma.hbm_to_vmem [thread:$0]  (!%p1411_p12), %s1562_s4, 16, %s356_s17, [#allocation6]  }
  0x2d   : > { %p1183_p10 = pnand %p1182_p5, %p1176_p0 }
  0x2f   : > { %1186 = shalt.err (!%p1183_p10)
}
  0x30   : > { %s1563_s3 = sld [smem:[#allocation15_spill]]  ;;  %s1198_s17 = scalar_lea.vmem %s1415_s28, 16 }
  0x31   : > { %p1199_p2 = scmp.ne.s32.totalorder %s1415_s28, %s1198_s17  ;;  %s1205_s30 = scalar_lea.vmem %s1415_s28, 32 }
  0x32   : > { %p1206_p5 = scmp.lt.s32.totalorder %s1415_s28, %s1415_s28  ;;  %p1207_p6 = scmp.lt.s32.totalorder %s1205_s30, %s1198_s17 }
  0x33   : > { %p1201_p9 = pnand %p1199_p2, %p1137_p13 }
  0x34   : > { %p1208_p10 = por %p1207_p6, %p1206_p5 }
  0x35   : > { %p1202_p3 = pneg %p1201_p9 }
  0x36   : > { %1076 = dma.hbm_to_vmem [thread:$0]  (!%p1411_p12), %s1563_s3, 64, %s345_s19, [#allocation3]  }
  0x37   : > { %p1209_p4 = pnand %p1208_p10, %p1202_p3 }
  0x39   : > { %1212 = shalt.err (!%p1209_p4)
}
  0x3a   : > { %1082 = dma.hbm_to_vmem [thread:$0]  (!%p1411_p12), %s1543_s6, 16, %s1415_s28, [#allocation6]  }
  0x3b   : > { %p1564_p7 = scmp.ne.s32.totalorder %s1560_s15, 0 }
  0x3c   : > { %p1565_p13 = scmp.eq.s32.totalorder (!%p1564_p7), %s1375_s25, 0 }
  0x3d   : > { %415 = sbr.rel (%p1564_p7) target bundleno = 917 (0x395), region = 64 }
  0x42   : > { %1256 = dma.done.wait (%p1565_p13), [#allocation3], 64   ;;  %p1566_p8 = pmov %p1565_p13 }
  0x44   : > { %1258 = vsyncadd (%p1566_p8), [#allocation3], 4294967232  ;;  %p1567_p11 = pmov %p1566_p8 }
  0x45   : > { %p1568_p0 = pmov %p1566_p8 }
  0x46   : > { %1260 = dma.done.wait (%p1567_p11), [#allocation6], 32  }
  0x47   : > { %1262 = vsyncadd (%p1568_p0), [#allocation6], 4294967264  ;;  %p476_p1 = scmp.lt.s32.totalorder %s1375_s25, 1  ;;  %v1286_v0 = vmov 0.0   ;;  %vm1287_vm0 = vmmov 0   ;;  %vm507_vm1 = vcmask 1043456  }
  0x48   : > { %1037 = vmatprep.subr.mxu0 %v1286_v0  ;;  %1039 = vmatprep.mubr.msk.f32.mxu0 %vm1287_vm0, %v1286_v0  ;;  %s1569_s0 = sld [smem:[#allocation13_spill]]  ;;  %vm503_vm2 = vcmask 31744   ;;  %v493_v1 = vld [vmem:[#allocation2] sm:$0xf]  ;;  %v495_v3 = vld [vmem:[%s1542_s5] sm:$0xff]  ;;  %vm592_vm3 = vcmask 64512  }
  0x49   : > { %s477_s15 = scalar_select %p476_p1, %s1375_s25, 1  ;;  %1042 = vmatprep.subr.mxu1 %v1286_v0  ;;  %1044 = vmatprep.mubr.msk.f32.mxu1 %vm1287_vm0, %v1286_v0  ;;  %v1015_v4 = vld [vmem:[#allocation5] ss:$0 sm:$0xff]  ;;  %v669_v13 = vld [vmem:[%s1544_s7] sm:$0xff]  ;;  %v1018_v14 = vld [vmem:[#allocation7] ss:$0 sm:$0xff] }
  0x4a   : > { %1038 = vmatpush3.msk.msra.mxu0 %vm507_vm1, %v493_v1  ;;  %1043 = vmatpush3.msra.mxu1 %v495_v3  ;;  %s1570_s1 = sld [smem:[#allocation14_spill]]  ;;  %v672_v20 = vld [vmem:[%s1546_s9 + $0x8] sm:$0xff]  ;;  %v671_v21 = vld [vmem:[%s1546_s9] sm:$0xff]  ;;  %vm764_vm4 = vcmask 130048   ;;  %s473_s28 = sand.u32 1, %s1273_s22  }
  0x4b   : > { %s1463_s19 = sshll.u32 %s477_s15, 3  ;;  %1047 = vmatprep.subr.mxu0 %v1286_v0  ;;  %1052 = vmatprep.subr.mxu1 %v1286_v0  ;;  %v1020_v22 = vld [vmem:[%s1545_s8] ss:$0 sm:$0xff]  ;;  %s1025_s15 = sshll.u32 %s1375_s25, 7 }
  0x4c   : > { %s491_s16 = scalar_lea.vmem %s1548_s11, %s1463_s19  ;;  %s487_s30 = scalar_lea.vmem %s1539_s2, %s1463_s19  ;;  %v1022_v31 = vld [vmem:[%s1547_s10] ss:$0 sm:$0xff] }
  0x4d   : > { %v838_v33 = vld [vmem:[%s487_s30] sm:$0xff]  ;;  %s860_s4 = scalar_lea.hbm %s1549_s12, %s1025_s15  ;;  %p1571_p2 = scmp.ne.s32.totalorder %s1558_s13, 0 }
  0x4e   : > { %s479_s29 = scalar_lea.vmem %s1569_s0, %s1463_s19  ;;  %s1288_s17 = smov [#allocation8]  }
  0x4f   : > { %v492_v2 = vld [vmem:[%s479_s29] sm:$0xff]  ;;  %s1010_s29 = sshll.u32 %s473_s28, 3  ;;  %s1217_s25 = sshll.u32 %s1288_s17, 4  ;;  %s1218_s25 = int_to_ptr.vmem [resolvable:$false] %s1217_s25 }
  0x50   : > { %1040 = vmatmul.mubr.msk.f32.vlgmr.msra.gmra.mxu0 %vm503_vm2, %v492_v2  ;;  %s483_s20 = scalar_lea.vmem %s1570_s1, %s1463_s19  ;;  %s846_s19 = scalar_lea.sflag [#allocation4], %s473_s28 }
  0x51   : > { %1049 = vmatprep.mubr.msk.f32.mxu0 %vm1287_vm0, %v1286_v0  ;;  %1048 = vmatpush3.msra.mxu0 %v669_v13  ;;  %v666_v16 = vld [vmem:[%s483_s20] sm:$0xff]  ;;  %s475_s20 = scalar_lea.vmem [#allocation8], %s1010_s29  ;;  %s1219_s29 = scalar_lea.vmem %s1218_s25, 256 }
  0x52   : > { %s862_s0 = sshll.u32 %s475_s20, 4  ;;  %s863_s0 = int_to_ptr.vmem [resolvable:$true] %s862_s0 }
  0x53   : > { %p1220_p5 = scmp.lt.s32.totalorder %s863_s0, %s1218_s25 }
 0x110   : > { %v577_v5 = vpop.f32.mrf.mxu0 }
 0x111   : > { %v578_v6 = vadd.f32 %v1015_v4, %v577_v5 }
 0x112   : > { %v1041_v7 = vpop.f32.mrf.mxu0 }
 0x113   : > { %v582_v8 = vmul.f32 0.70710677, %v578_v6  ;;  %v581_v10 = vmul.f32 0.5, %v578_v6 }
 0x115   : > { %1131 = verf.f32 %v582_v8 }
 0x122   : > { %v1132_v9 = vpop.eup %1131 }
 0x123   : > { %v584_v11 = vadd.f32 1.0, %v1132_v9 }
 0x125   : > { %v585_v12 = vmul.f32 %v584_v11, %v581_v10 }
 0x127   : > { %1045 = vmatmul.mubr.msk.f32.vlgmr.msra.gmra.mxu1 %vm592_vm3, %v585_v12 }
 0x128   : > { %1056 = vmatprep.mubr.msk.f32.mxu1 %vm1287_vm0, %v1286_v0  ;;  %1053 = vmatpush3.msra.mxu1 %v672_v20 }
 0x129   : > { %1054 = vmatprep.subr.mxu1 %v1286_v0 }
 0x12a   : > { %1055 = vmatpush3.msra.mxu1 %v671_v21 }
 0x1e7   : > { %v662_v15 = vpop.f32.mrf.mxu1 }
 0x1e8   : > { %v663_v17 = vadd.f32 %v1018_v14, %v662_v15 }
 0x1e9   : > { %v1046_v18 = vpop.f32.mrf.mxu1 }
 0x1ea   : > { %v667_v19 = vadd.f32 %v666_v16, %v663_v17 }
 0x1ec   : > { %668 = vst.msk [vmem:[%s491_s16] sm:$0xff] %vm592_vm3, %v667_v19  ;;  %1050 = vmatmul.mubr.msk.f32.vlgmr.msra.gmra.mxu0 %vm592_vm3, %v667_v19  ;;  %s1213_s16 = scalar_lea.vmem %s863_s0, 128 }
 0x1ed   : > { %p1214_p12 = scmp.ne.s32.totalorder %s863_s0, %s1213_s16  ;;  %p1221_p6 = scmp.lt.s32.totalorder %s1219_s29, %s1213_s16 }
 0x1ef   : > { %p1215_p9 = pnand %p1214_p12, %p1571_p2  ;;  %p1222_p10 = por %p1221_p6, %p1220_p5 }
 0x1f1   : > { %p1216_p3 = pneg %p1215_p9 }
 0x1f3   : > { %p1223_p4 = pnand %p1222_p10, %p1216_p3 }
 0x2ac   : > { %v749_v23 = vpop.f32.mrf.mxu0 }
 0x2ad   : > { %v750_v24 = vadd.f32 %v1020_v22, %v749_v23 }
 0x2ae   : > { %v1051_v25 = vpop.f32.mrf.mxu0 }
 0x2af   : > { %v754_v26 = vmul.f32 0.70710677, %v750_v24  ;;  %v753_v28 = vmul.f32 0.5, %v750_v24 }
 0x2b1   : > { %1133 = verf.f32 %v754_v26 }
 0x2be   : > { %v1134_v27 = vpop.eup %1133 }
 0x2bf   : > { %v756_v29 = vadd.f32 1.0, %v1134_v27 }
 0x2c1   : > { %v757_v30 = vmul.f32 %v756_v29, %v753_v28 }
 0x2c3   : > { %1057 = vmatmul.mubr.msk.f32.vlgmr.msra.gmra.mxu1 %vm764_vm4, %v757_v30 }
 0x383   : > { %v834_v32 = vpop.f32.mrf.mxu1 }
 0x384   : > { %v835_v34 = vadd.f32 %v1022_v31, %v834_v32 }
 0x385   : > { %v1058_v35 = vpop.f32.mrf.mxu1 }
 0x386   : > { %v839_v36 = vadd.f32 %v838_v33, %v835_v34 }
 0x388   : > { %840 = vst.msk [vmem:[%s475_s20] sm:$0xff] %vm764_vm4, %v839_v36 }
 0x389   : > { %1226 = shalt.err (!%p1223_p4)
}
 0x38a   : > { %s1227_s1 = scalar_lea.hbm %s860_s4, 128  ;;  %s1231_s30 = scalar_lea.hbm %s1549_s12, 256 }
 0x38b   : > { %p1228_p7 = scmp.ne.s32.totalorder %s860_s4, %s1227_s1  ;;  %p1232_p11 = scmp.lt.s32.totalorder %s860_s4, %s1549_s12 }
 0x38c   : > { %p1233_p0 = scmp.lt.s32.totalorder %s1231_s30, %s1227_s1 }
 0x38d   : > { %p1229_p13 = pnand %p1228_p7, %p1571_p2 }
 0x38e   : > { %p1234_p1 = por %p1233_p0, %p1232_p11 }
 0x38f   : > { %p1230_p8 = pneg %p1229_p13 }
 0x391   : > { %p1235_p12 = pnand %p1234_p1, %p1230_p8 }
 0x393   : > { %1238 = shalt.err (!%p1235_p12)
}
 0x394   : > { %1071 = dma.vmem_to_hbm [thread:$0]  (%p1571_p2), %s863_s0, 128, %s860_s4, %s846_s19  }
 0x395 PF: > { %p1093_p9 = scmp.ge.s32.totalorder %s1281_s24, 2  ;;  %s881_s15 = sand.u32 1, %s1269_s21  }
 0x396   : > { %p1572_p3 = scmp.ne.s32.totalorder %s1559_s14, 0  ;;  %s882_s20 = scalar_lea.sflag [#allocation4], %s881_s15 }
 0x398   : > { %p1084_p5 = pnand %p1093_p9, %p1572_p3 }
 0x39a   : > { %p1085_p6 = pneg %p1084_p5 }
 0x39c   : > { %1264 = dma.done.wait (%p1085_p6), %s882_s20, 128  }
 0x39d   : > { %1266 = vsyncadd (%p1085_p6), %s882_s20, 4294967168  ;;  %s1573_s16 = sld [smem:[#allocation12_spill]]  ;;  %p25_p10 = scmp.ge.s32.totalorder %s1379_s27, 4  }
 0x39e   : > { %s1574_s21 = smov %s1273_s22  ;;  %s1575_s22 = smov %s1277_s23 }
 0x39f   : > { %s1577_s24 = smov %s1379_s27  ;;  %27 = sbr.rel (!%p25_p10) target bundleno = 10 (0xa), region = 130 }
 0x3a3   : > { %s1576_s23 = smov %s1573_s16 }
 0x3a4   :  { %887 = vsyncpa [#allocation3], 1 }
 0x3a5   :  { %889 = vsyncpa [#allocation3 + $0x1], 1 }
 0x3a6   :  { %890 = vsyncpa [#allocation6], 1 }
 0x3a7   :  { %891 = vsyncpa [#allocation4], 1 }
 0x3a8   :  { %893 = vsyncpa [#allocation4 + $0x1], 1 }

</bundles_post_ra>
